<compile_context>
chip_gen: v7x
topology: tpu7x:2x2x1
jax: 0.10.0
libtpu: 0.0.40
codegen_flags: <defaults>
</compile_context>

<pallas_src>
import jax
import jax.numpy as jnp
import numpy as np
from jax.experimental import pallas as pl
from jax.experimental.pallas import tpu as pltpu


def _identity_dma_kernel(x_hbm_ref, o_hbm_ref, sem):
    # fk = f0 : one full-array HBM->HBM DMA.  No VMEM staging, no vld/vst.
    cp = pltpu.make_async_copy(x_hbm_ref, o_hbm_ref, sem)
    cp.start()
    cp.wait()


def identity_flow_forward(f0, *, use_pallas: bool = True):
    """IdentityFlow.forward: fk = f0 (shape/dtype preserved)."""
    if not use_pallas or f0.size == 0:
        # Identity is metadata-only in XLA; the zero-cost path is no kernel.
        return f0

    return pl.pallas_call(
        _identity_dma_kernel,
        out_shape=jax.ShapeDtypeStruct(f0.shape, f0.dtype),
        # Leave both operands in HBM; the kernel moves the bytes itself.
        in_specs=[pl.BlockSpec(memory_space=pl.ANY)],
        out_specs=pl.BlockSpec(memory_space=pl.ANY),
        scratch_shapes=[pltpu.SemaphoreType.DMA(())],
    )(f0)


def identity_flow_inverse(f, *, use_pallas: bool = True):
    """IdentityFlow.inverse: also the identity (module overrides Newton solve)."""
    # TODO(synk): base-class Flow.newton_method / forward_grad / inverse_grad are
    # autograd utilities not used by IdentityFlow (inverse is overridden), so they
    # are intentionally not ported to Pallas.
    return identity_flow_forward(f, use_pallas=use_pallas)


if __name__ == "__main__":
    key = jax.random.PRNGKey(0)
    x = jax.random.normal(key, (2, 4, 16, 16), dtype=jnp.float32)
    x_host = np.asarray(x)  # reference copy captured before any kernel call

    y = jax.block_until_ready(identity_flow_forward(x))
    assert y.shape == x.shape and y.dtype == x.dtype
    np.testing.assert_array_equal(np.asarray(y), x_host)

    z = jax.block_until_ready(identity_flow_inverse(x))
    assert z.shape == x.shape and z.dtype == x.dtype
    np.testing.assert_array_equal(np.asarray(z), x_host)

    # Zero-cost (no-kernel) path also preserves values.
    w = jax.block_until_ready(identity_flow_forward(x, use_pallas=False))
    np.testing.assert_array_equal(np.asarray(w), x_host)

    print("KERNEL_OK")
</pallas_src>

<mosaic_0001>
module attributes {stable_mosaic.version = 11 : i64} {
  func.func @_identity_dma_kernel(%arg0: memref<2x4x16x16xf32, #tpu.memory_space<any>>, %arg1: memref<2x4x16x16xf32, #tpu.memory_space<any>>, %arg2: memref<!tpu.dma_semaphore, #tpu.memory_space<semaphore_mem>>) attributes {dimension_semantics = [], scalar_prefetch = 0 : i64, scratch_operands = 1 : i64, tpu.core_type = #tpu.core_type<tc>} {
    tpu.enqueue_dma source(%arg0 : memref<2x4x16x16xf32, #tpu.memory_space<any>>) target(%arg1 : memref<2x4x16x16xf32, #tpu.memory_space<any>>) target_semaphore(%arg2 : memref<!tpu.dma_semaphore, #tpu.memory_space<semaphore_mem>>)
    tpu.wait_dma2 semaphore(%arg2 : memref<!tpu.dma_semaphore, #tpu.memory_space<semaphore_mem>>) src(%arg0 : memref<2x4x16x16xf32, #tpu.memory_space<any>>) dst(%arg1 : memref<2x4x16x16xf32, #tpu.memory_space<any>>)
    return
  }
}

</mosaic_0001>

<bundles_post_ra>
// kernel: tpu_custom_call.1
= control target key start
LH: loop header
LB: loop body
LE: loop exit
PB: predicated region body
PF: predicated region fallthrough
CT: control target
= control target key end

     0   :  { %s36_s6 = smov [#allocation2]   ;;  %s37_s7 = smov [#allocation3]   ;;  %s55_s0 = inlined_call_operand.hbm [shape: f32[2,4,16,16], index: 0, kind: input, shape index: {}]   ;;  %s56_s1 = inlined_call_operand.hbm [shape: f32[2,4,16,16], index: 1, kind: output, shape index: {}]  }
   0x1   :  { %s38_s8 = smov 0  }
   0x2   :  { %18 = dma.general %s55_s0, 2048, %s56_s1, %s36_s6, %s37_s7, [#allocation4], %s38_s8, 0  }
   0x3   :  { %34 = dma.done.wait [#allocation2], 2048 }
   0x4   :  { %35 = vsyncadd [#allocation2], 4294965248 }
   0x5   :  { %24 = vsyncmov [#allocation2] }
   0x8   :  { %s25_s13 = vpop.sfrf %24 }
   0x9   :  { %p30_p0 = scmp.ne.s32.totalorder %s25_s13, 0 }
   0xb   :  { %29 = shalt.err (%p30_p0)  }

</bundles_post_ra>
